<compile_context>
chip_gen: v7x
topology: tpu7x:2x2x1
jax: 0.10.0
libtpu: 0.0.40
codegen_flags: <defaults>
</compile_context>

<pallas_src>
import functools

import jax
import jax.numpy as jnp
from jax import lax
from jax.experimental import pallas as pl
from jax.experimental.pallas import tpu as pltpu


EXPANSION = 4
BN_EPS = 1e-5


def _bottleneck_kernel(x_ref, edge_ref,
                       w1_ref, t1_ref,
                       w2_ref, t2_ref,
                       w3s_ref, t3s_ref,
                       o_ref, *, W):
    """Channel-major block:  x_ref (Cin, Mb), o_ref (4P, Mb), Mb = nb*H*W.

    w1   : (P, Cin)        1x1 conv, BN1 scale folded in
    w2   : (P, 9P)         3x3 conv as im2col weight, BN2 scale folded in
    w3s  : (4P, P+Cin)     [conv3 | shortcut] fused, BN scales folded in
    t*   : (C, 1)          folded BN shifts (+conv bias), f32
    edge : (9, Mb)         0/1 boundary masks for the 9 conv2 taps
    """
    x_bf = x_ref[...]                                             # (Cin, Mb) bf16

    # ---- conv1 (1x1) + bn1 + relu ----
    h1 = jnp.dot(w1_ref[...], x_bf, preferred_element_type=jnp.float32)
    h1 = jnp.maximum(h1 + t1_ref[...], 0.0)                       # (P, Mb) f32

    # ---- conv2 (3x3, pad=1, stride=1) as a single im2col matmul ----
    # tap(dh,dw)[:, r] = h1[:, r + dh*W + dw], zeroed where (h+dh, w+dw) is outside
    # the image (mask precomputed in the wrapper).  Rolls are along the lane axis.
    Mb = h1.shape[1]
    taps = []
    k = 0
    for dh in (-1, 0, 1):
        for dw in (-1, 0, 1):
            amt = (-(dh * W + dw)) % Mb
            tap = pltpu.roll(h1, shift=amt, axis=1) if amt != 0 else h1
            if k != 4:                                            # center tap: no mask
                tap = tap * edge_ref[k:k + 1, :]
            taps.append(tap)
            k += 1
    cols = jnp.concatenate(taps, axis=0).astype(jnp.bfloat16)     # (9P, Mb)
    h2 = jnp.dot(w2_ref[...], cols, preferred_element_type=jnp.float32)
    h2 = jnp.maximum(h2 + t2_ref[...], 0.0)                       # (P, Mb) f32

    # ---- conv3 (1x1) + bn3, fused with shortcut 1x1 conv + bn ----
    h2x = jnp.concatenate([h2, x_bf.astype(jnp.float32)], axis=0)  # (P+Cin, Mb) f32
    h2x = h2x.astype(jnp.bfloat16)
    out = jnp.dot(w3s_ref[...], h2x, preferred_element_type=jnp.float32)
    out = jnp.maximum(out + t3s_ref[...], 0.0)                    # (4P, Mb)
    o_ref[...] = out.astype(o_ref.dtype)


def _boundary_masks(N, H, W):
    """(9, N*H*W) f32 {0,1} masks; mask k=(dh+1)*3+(dw+1) is 1 where (h+dh,w+dw) valid."""
    hh = jnp.arange(H)[:, None]
    ww = jnp.arange(W)[None, :]
    ms = []
    for dh in (-1, 0, 1):
        for dw in (-1, 0, 1):
            ok = ((hh + dh >= 0) & (hh + dh < H) &
                  (ww + dw >= 0) & (ww + dw < W)).astype(jnp.float32)   # (H, W)
            ms.append(jnp.broadcast_to(ok[None], (N, H, W)).reshape(N * H * W))
    return jnp.stack(ms, axis=0)


def bottleneck_forward(x_nchw, prep, *, m_block=None):
    """x_nchw: (N, Cin, H, W) float32.  Returns (N, 4*planes, H, W) float32."""
    N, Cin, H, W = x_nchw.shape
    P = prep["w1t"].shape[0]
    Cout = EXPANSION * P
    M = N * H * W

    if m_block is None:
        m_block = M                       # whole batch in one grid step at toy sizes
    assert M % m_block == 0 and m_block % (H * W) == 0
    assert m_block == M or m_block % 128 == 0

    # channel-major, lane-dense activation layout (C, N*H*W); bf16 for the MXU.
    xt = jnp.transpose(x_nchw, (1, 0, 2, 3)).reshape(Cin, M).astype(jnp.bfloat16)
    edge = _boundary_masks(N, H, W)                               # (9, M) f32

    args = (xt, edge, prep["w1t"], prep["t1"], prep["w2t"], prep["t2"],
            prep["w3st"], prep["t3s"])

    def _full(a):
        nd = a.ndim
        return pl.BlockSpec(a.shape, lambda b, _n=nd: (0,) * _n)

    in_specs = [pl.BlockSpec((Cin, m_block), lambda b: (0, b)),
                pl.BlockSpec((9, m_block), lambda b: (0, b))]
    in_specs += [_full(a) for a in args[2:]]

    out_flat = pl.pallas_call(
        functools.partial(_bottleneck_kernel, W=W),
        out_shape=jax.ShapeDtypeStruct((Cout, M), jnp.float32),
        grid=(M // m_block,),
        in_specs=in_specs,
        out_specs=pl.BlockSpec((Cout, m_block), lambda b: (0, b)),
        compiler_params=pltpu.CompilerParams(
            dimension_semantics=("parallel",)),
    )(*args)

    # (Cout, N*H*W) -> (N, Cout, H, W).  If adjacent layers also use the channel-major
    # layout, this transpose (and the input one) disappears from the per-call path.
    return jnp.transpose(out_flat.reshape(Cout, N, H, W), (1, 0, 2, 3))


# --------------------------------------------------------------------------
# Parameters: raw PyTorch-shaped params + a prep step that folds BN scales into
# the weights, fuses conv3/shortcut, and casts MXU operands to bf16.
# --------------------------------------------------------------------------
def make_params(key, in_planes, planes, stride=1):
    cout = EXPANSION * planes
    it = iter(jax.random.split(key, 32))

    def conv(out_c, in_c, kh, kw):
        fan_in = in_c * kh * kw
        w = jax.random.normal(next(it), (out_c, in_c, kh, kw), jnp.float32) / jnp.sqrt(fan_in)
        b = 0.1 * jax.random.normal(next(it), (out_c,), jnp.float32)
        return w, b

    def bn(c):
        return dict(
            gamma=1.0 + 0.1 * jax.random.normal(next(it), (c,), jnp.float32),
            beta=0.1 * jax.random.normal(next(it), (c,), jnp.float32),
            mean=0.1 * jax.random.normal(next(it), (c,), jnp.float32),
            var=jnp.abs(jax.random.normal(next(it), (c,), jnp.float32)) + 0.5)

    w1, b1 = conv(planes, in_planes, 1, 1)
    w2, b2 = conv(planes, planes, 3, 3)
    w3, b3 = conv(cout, planes, 1, 1)
    ws, bs = conv(cout, in_planes, 1, 1)
    return dict(w1=w1, b1=b1, bn1=bn(planes), w2=w2, b2=b2, bn2=bn(planes),
                w3=w3, b3=b3, bn3=bn(cout), ws=ws, bs=bs, bns=bn(cout),
                in_planes=in_planes, planes=planes, stride=stride)


def _scale_shift(bn, bias):
    s = bn["gamma"] / jnp.sqrt(bn["var"] + BN_EPS)
    t = (bias - bn["mean"]) * s + bn["beta"]
    return s, t


def prepare_params(raw):
    P, Cin = raw["planes"], raw["in_planes"]
    cout = EXPANSION * P
    s1, t1 = _scale_shift(raw["bn1"], raw["b1"])
    s2, t2 = _scale_shift(raw["bn2"], raw["b2"])
    s3, t3 = _scale_shift(raw["bn3"], raw["b3"])

    w1t = (raw["w1"][:, :, 0, 0] * s1[:, None]).astype(jnp.bfloat16)          # (P, Cin)
    w2sc = raw["w2"] * s2[:, None, None, None]                                # OIHW
    w2t = jnp.transpose(w2sc, (0, 2, 3, 1)).reshape(P, 9 * P).astype(jnp.bfloat16)
    w3 = raw["w3"][:, :, 0, 0] * s3[:, None]                                  # (4P, P)

    if raw["stride"] == 1 and Cin == cout:
        ws = jnp.eye(cout, Cin, dtype=jnp.float32)                            # identity shortcut
        tsc = jnp.zeros((cout,), jnp.float32)
    else:
        ss, tsc = _scale_shift(raw["bns"], raw["bs"])
        ws = raw["ws"][:, :, 0, 0] * ss[:, None]                              # (4P, Cin)

    w3st = jnp.concatenate([w3, ws], axis=1).astype(jnp.bfloat16)             # (4P, P+Cin)
    return dict(w1t=w1t, t1=t1[:, None], w2t=w2t, t2=t2[:, None],
                w3st=w3st, t3s=(t3 + tsc)[:, None])


# Pure-JAX reference (standard conv ops, same bf16 rounding points as the kernel).
def ref_forward(x_nchw, raw):
    P, Cin = raw["planes"], raw["in_planes"]
    cout = EXPANSION * P
    s1, t1 = _scale_shift(raw["bn1"], raw["b1"])
    s2, t2 = _scale_shift(raw["bn2"], raw["b2"])
    s3, t3 = _scale_shift(raw["bn3"], raw["b3"])

    x = jnp.transpose(x_nchw, (0, 2, 3, 1))
    xb = x.astype(jnp.bfloat16)

    w1 = (raw["w1"][:, :, 0, 0] * s1[:, None]).astype(jnp.bfloat16)
    h1 = jnp.einsum('nhwc,oc->nhwo', xb, w1, preferred_element_type=jnp.float32) + t1
    h1 = jnp.maximum(h1, 0.0)

    w2_hwio = jnp.transpose(raw["w2"] * s2[:, None, None, None], (2, 3, 1, 0)).astype(jnp.bfloat16)
    h2 = lax.conv_general_dilated(
        h1.astype(jnp.bfloat16), w2_hwio, window_strides=(1, 1),
        padding=((1, 1), (1, 1)), dimension_numbers=('NHWC', 'HWIO', 'NHWC'),
        preferred_element_type=jnp.float32)
    h2 = jnp.maximum(h2 + t2, 0.0)

    w3 = (raw["w3"][:, :, 0, 0] * s3[:, None]).astype(jnp.bfloat16)
    h3 = jnp.einsum('nhwp,op->nhwo', h2.astype(jnp.bfloat16), w3,
                    preferred_element_type=jnp.float32) + t3
    if raw["stride"] == 1 and Cin == cout:
        sc = x
    else:
        ss, tsc = _scale_shift(raw["bns"], raw["bs"])
        wsc = (raw["ws"][:, :, 0, 0] * ss[:, None]).astype(jnp.bfloat16)
        sc = jnp.einsum('nhwc,oc->nhwo', xb, wsc, preferred_element_type=jnp.float32) + tsc
    out = jnp.maximum(h3 + sc, 0.0)
    return jnp.transpose(out, (0, 3, 1, 2))


if __name__ == "__main__":
    key = jax.random.PRNGKey(0)
    k_x, k_p = jax.random.split(key)

    N, in_planes, planes, H, W = 2, 16, 8, 16, 16
    x = jax.random.normal(k_x, (N, in_planes, H, W), jnp.float32)
    raw = make_params(k_p, in_planes, planes)
    prep = prepare_params(raw)

    out = jax.block_until_ready(bottleneck_forward(x, prep))
    ref = jax.block_until_ready(ref_forward(x, raw))

    assert out.shape == (N, EXPANSION * planes, H, W)
    err = float(jnp.max(jnp.abs(out - ref)))
    scale = float(jnp.max(jnp.abs(ref)))
    assert err <= 2e-2 * (1.0 + scale), f"mismatch vs reference: {err}"

    print("KERNEL_OK")
</pallas_src>

<mosaic_0001>
module attributes {stable_mosaic.version = 11 : i64} {
  func.func @_bottleneck_kernel(%arg0: i32, %arg1: memref<16x512xbf16, #tpu.memory_space<vmem>>, %arg2: memref<9x512xf32, #tpu.memory_space<vmem>>, %arg3: memref<8x16xbf16, #tpu.memory_space<vmem>>, %arg4: memref<8x1xf32, #tpu.memory_space<vmem>>, %arg5: memref<8x72xbf16, #tpu.memory_space<vmem>>, %arg6: memref<8x1xf32, #tpu.memory_space<vmem>>, %arg7: memref<32x24xbf16, #tpu.memory_space<vmem>>, %arg8: memref<32x1xf32, #tpu.memory_space<vmem>>, %arg9: memref<32x512xf32, #tpu.memory_space<vmem>>) attributes {dimension_semantics = [#tpu.dimension_semantics<parallel>], iteration_bounds = array<i64: 1>, scalar_prefetch = 0 : i64, scratch_operands = 0 : i64, tpu.core_type = #tpu.core_type<tc>, window_params = [{transform_indices = @transform_0, window_bounds = array<i64: 16, 512>}, {transform_indices = @transform_1, window_bounds = array<i64: 9, 512>}, {pipeline_mode = #tpu.pipeline_mode<synchronous>, transform_indices = @transform_2, window_bounds = array<i64: 8, 16>}, {pipeline_mode = #tpu.pipeline_mode<synchronous>, transform_indices = @transform_3, window_bounds = array<i64: 8, 1>}, {pipeline_mode = #tpu.pipeline_mode<synchronous>, transform_indices = @transform_4, window_bounds = array<i64: 8, 72>}, {pipeline_mode = #tpu.pipeline_mode<synchronous>, transform_indices = @transform_5, window_bounds = array<i64: 8, 1>}, {pipeline_mode = #tpu.pipeline_mode<synchronous>, transform_indices = @transform_6, window_bounds = array<i64: 32, 24>}, {pipeline_mode = #tpu.pipeline_mode<synchronous>, transform_indices = @transform_7, window_bounds = array<i64: 32, 1>}, {transform_indices = @transform_8, window_bounds = array<i64: 32, 512>}]} {
    %c0 = arith.constant 0 : index
    %c0_0 = arith.constant 0 : index
    %0 = vector.load %arg1[%c0, %c0_0] : memref<16x512xbf16, #tpu.memory_space<vmem>>, vector<16x512xbf16>
    %c0_1 = arith.constant 0 : index
    %c0_2 = arith.constant 0 : index
    %1 = vector.load %arg3[%c0_1, %c0_2] : memref<8x16xbf16, #tpu.memory_space<vmem>>, vector<8x16xbf16>
    %cst = arith.constant dense<0.000000e+00> : vector<8x512xf32>
    %2 = tpu.matmul %1, %0, %cst {dimension_numbers = #tpu.dot_dimension_numbers<[1], [0], [0], [1], [0, 0, 1, 1], [], []>} : vector<8x16xbf16>, vector<16x512xbf16>, vector<8x512xf32> -> vector<8x512xf32>
    %c0_3 = arith.constant 0 : index
    %c0_4 = arith.constant 0 : index
    %3 = vector.load %arg4[%c0_3, %c0_4] : memref<8x1xf32, #tpu.memory_space<vmem>>, vector<8x1xf32>
    %4 = vector.broadcast %3 : vector<8x1xf32> to vector<8x512xf32>
    %5 = arith.addf %2, %4 : vector<8x512xf32>
    %cst_5 = arith.constant 0.000000e+00 : f32
    %6 = vector.broadcast %cst_5 : f32 to vector<8x512xf32>
    %7 = arith.maximumf %5, %6 : vector<8x512xf32>
    %c17_i32 = arith.constant 17 : i32
    %8 = tpu.dynamic_rotate %7 by %c17_i32 dim 1 : vector<8x512xf32>, i32 -> vector<8x512xf32>
    %c0_6 = arith.constant 0 : index
    %c0_7 = arith.constant 0 : index
    %9 = vector.load %arg2[%c0_6, %c0_7] : memref<9x512xf32, #tpu.memory_space<vmem>>, vector<1x512xf32>
    %10 = vector.broadcast %9 : vector<1x512xf32> to vector<8x512xf32>
    %11 = arith.mulf %8, %10 : vector<8x512xf32>
    %c16_i32 = arith.constant 16 : i32
    %12 = tpu.dynamic_rotate %7 by %c16_i32 dim 1 : vector<8x512xf32>, i32 -> vector<8x512xf32>
    %c1 = arith.constant 1 : index
    %c0_8 = arith.constant 0 : index
    %13 = vector.load %arg2[%c1, %c0_8] : memref<9x512xf32, #tpu.memory_space<vmem>>, vector<1x512xf32>
    %14 = vector.broadcast %13 : vector<1x512xf32> to vector<8x512xf32>
    %15 = arith.mulf %12, %14 : vector<8x512xf32>
    %c15_i32 = arith.constant 15 : i32
    %16 = tpu.dynamic_rotate %7 by %c15_i32 dim 1 : vector<8x512xf32>, i32 -> vector<8x512xf32>
    %c2 = arith.constant 2 : index
    %c0_9 = arith.constant 0 : index
    %17 = vector.load %arg2[%c2, %c0_9] : memref<9x512xf32, #tpu.memory_space<vmem>>, vector<1x512xf32>
    %18 = vector.broadcast %17 : vector<1x512xf32> to vector<8x512xf32>
    %19 = arith.mulf %16, %18 : vector<8x512xf32>
    %c1_i32 = arith.constant 1 : i32
    %20 = tpu.dynamic_rotate %7 by %c1_i32 dim 1 : vector<8x512xf32>, i32 -> vector<8x512xf32>
    %c3 = arith.constant 3 : index
    %c0_10 = arith.constant 0 : index
    %21 = vector.load %arg2[%c3, %c0_10] : memref<9x512xf32, #tpu.memory_space<vmem>>, vector<1x512xf32>
    %22 = vector.broadcast %21 : vector<1x512xf32> to vector<8x512xf32>
    %23 = arith.mulf %20, %22 : vector<8x512xf32>
    %c511_i32 = arith.constant 511 : i32
    %24 = tpu.dynamic_rotate %7 by %c511_i32 dim 1 : vector<8x512xf32>, i32 -> vector<8x512xf32>
    %c5 = arith.constant 5 : index
    %c0_11 = arith.constant 0 : index
    %25 = vector.load %arg2[%c5, %c0_11] : memref<9x512xf32, #tpu.memory_space<vmem>>, vector<1x512xf32>
    %26 = vector.broadcast %25 : vector<1x512xf32> to vector<8x512xf32>
    %27 = arith.mulf %24, %26 : vector<8x512xf32>
    %c497_i32 = arith.constant 497 : i32
    %28 = tpu.dynamic_rotate %7 by %c497_i32 dim 1 : vector<8x512xf32>, i32 -> vector<8x512xf32>
    %c6 = arith.constant 6 : index
    %c0_12 = arith.constant 0 : index
    %29 = vector.load %arg2[%c6, %c0_12] : memref<9x512xf32, #tpu.memory_space<vmem>>, vector<1x512xf32>
    %30 = vector.broadcast %29 : vector<1x512xf32> to vector<8x512xf32>
    %31 = arith.mulf %28, %30 : vector<8x512xf32>
    %c496_i32 = arith.constant 496 : i32
    %32 = tpu.dynamic_rotate %7 by %c496_i32 dim 1 : vector<8x512xf32>, i32 -> vector<8x512xf32>
    %c7 = arith.constant 7 : index
    %c0_13 = arith.constant 0 : index
    %33 = vector.load %arg2[%c7, %c0_13] : memref<9x512xf32, #tpu.memory_space<vmem>>, vector<1x512xf32>
    %34 = vector.broadcast %33 : vector<1x512xf32> to vector<8x512xf32>
    %35 = arith.mulf %32, %34 : vector<8x512xf32>
    %c495_i32 = arith.constant 495 : i32
    %36 = tpu.dynamic_rotate %7 by %c495_i32 dim 1 : vector<8x512xf32>, i32 -> vector<8x512xf32>
    %c8 = arith.constant 8 : index
    %c0_14 = arith.constant 0 : index
    %37 = vector.load %arg2[%c8, %c0_14] : memref<9x512xf32, #tpu.memory_space<vmem>>, vector<1x512xf32>
    %38 = vector.broadcast %37 : vector<1x512xf32> to vector<8x512xf32>
    %39 = arith.mulf %36, %38 : vector<8x512xf32>
    %40 = tpu.concatenate %11, %15, %19, %23, %7, %27, %31, %35, %39 in 0 : vector<8x512xf32>, vector<8x512xf32>, vector<8x512xf32>, vector<8x512xf32>, vector<8x512xf32>, vector<8x512xf32>, vector<8x512xf32>, vector<8x512xf32>, vector<8x512xf32> -> vector<72x512xf32>
    %41 = arith.truncf %40 : vector<72x512xf32> to vector<72x512xbf16>
    %c0_15 = arith.constant 0 : index
    %c0_16 = arith.constant 0 : index
    %42 = vector.load %arg5[%c0_15, %c0_16] : memref<8x72xbf16, #tpu.memory_space<vmem>>, vector<8x72xbf16>
    %cst_17 = arith.constant dense<0.000000e+00> : vector<8x512xf32>
    %43 = tpu.matmul %42, %41, %cst_17 {dimension_numbers = #tpu.dot_dimension_numbers<[1], [0], [0], [1], [0, 0, 1, 1], [], []>} : vector<8x72xbf16>, vector<72x512xbf16>, vector<8x512xf32> -> vector<8x512xf32>
    %c0_18 = arith.constant 0 : index
    %c0_19 = arith.constant 0 : index
    %44 = vector.load %arg6[%c0_18, %c0_19] : memref<8x1xf32, #tpu.memory_space<vmem>>, vector<8x1xf32>
    %45 = vector.broadcast %44 : vector<8x1xf32> to vector<8x512xf32>
    %46 = arith.addf %43, %45 : vector<8x512xf32>
    %cst_20 = arith.constant 0.000000e+00 : f32
    %47 = vector.broadcast %cst_20 : f32 to vector<8x512xf32>
    %48 = arith.maximumf %46, %47 : vector<8x512xf32>
    %49 = arith.extf %0 : vector<16x512xbf16> to vector<16x512xf32>
    %50 = tpu.concatenate %48, %49 in 0 : vector<8x512xf32>, vector<16x512xf32> -> vector<24x512xf32>
    %51 = arith.truncf %50 : vector<24x512xf32> to vector<24x512xbf16>
    %c0_21 = arith.constant 0 : index
    %c0_22 = arith.constant 0 : index
    %52 = vector.load %arg7[%c0_21, %c0_22] : memref<32x24xbf16, #tpu.memory_space<vmem>>, vector<32x24xbf16>
    %cst_23 = arith.constant dense<0.000000e+00> : vector<32x512xf32>
    %53 = tpu.matmul %52, %51, %cst_23 {dimension_numbers = #tpu.dot_dimension_numbers<[1], [0], [0], [1], [0, 0, 1, 1], [], []>} : vector<32x24xbf16>, vector<24x512xbf16>, vector<32x512xf32> -> vector<32x512xf32>
    %c0_24 = arith.constant 0 : index
    %c0_25 = arith.constant 0 : index
    %54 = vector.load %arg8[%c0_24, %c0_25] : memref<32x1xf32, #tpu.memory_space<vmem>>, vector<32x1xf32>
    %55 = vector.broadcast %54 : vector<32x1xf32> to vector<32x512xf32>
    %56 = arith.addf %53, %55 : vector<32x512xf32>
    %cst_26 = arith.constant 0.000000e+00 : f32
    %57 = vector.broadcast %cst_26 : f32 to vector<32x512xf32>
    %58 = arith.maximumf %56, %57 : vector<32x512xf32>
    %c0_27 = arith.constant 0 : index
    %c0_28 = arith.constant 0 : index
    %59 = vector.load %arg9[%c0_27, %c0_28] : memref<32x512xf32, #tpu.memory_space<vmem>>, vector<32x512xf32>
    tpu.vector_store %arg9[%c0_27, %c0_28], %58 {strides = array<i32>} : memref<32x512xf32, #tpu.memory_space<vmem>>, vector<32x512xf32>,
    return
  }
  func.func @transform_0(%arg0: i32) -> (i32, i32) {
    %c0_i32 = arith.constant 0 : i32
    %c0_i32_0 = arith.constant 0 : i32
    return %c0_i32, %arg0 : i32, i32
  }
  func.func @transform_1(%arg0: i32) -> (i32, i32) {
    %c0_i32 = arith.constant 0 : i32
    %c0_i32_0 = arith.constant 0 : i32
    return %c0_i32, %arg0 : i32, i32
  }
  func.func @transform_2(%arg0: i32) -> (i32, i32) {
    %c0_i32 = arith.constant 0 : i32
    %c0_i32_0 = arith.constant 0 : i32
    %c0_i32_1 = arith.constant 0 : i32
    return %c0_i32, %c0_i32_0 : i32, i32
  }
  func.func @transform_3(%arg0: i32) -> (i32, i32) {
    %c0_i32 = arith.constant 0 : i32
    %c0_i32_0 = arith.constant 0 : i32
    %c0_i32_1 = arith.constant 0 : i32
    return %c0_i32, %c0_i32_0 : i32, i32
  }
  func.func @transform_4(%arg0: i32) -> (i32, i32) {
    %c0_i32 = arith.constant 0 : i32
    %c0_i32_0 = arith.constant 0 : i32
    %c0_i32_1 = arith.constant 0 : i32
    return %c0_i32, %c0_i32_0 : i32, i32
  }
  func.func @transform_5(%arg0: i32) -> (i32, i32) {
    %c0_i32 = arith.constant 0 : i32
    %c0_i32_0 = arith.constant 0 : i32
    %c0_i32_1 = arith.constant 0 : i32
    return %c0_i32, %c0_i32_0 : i32, i32
  }
  func.func @transform_6(%arg0: i32) -> (i32, i32) {
    %c0_i32 = arith.constant 0 : i32
    %c0_i32_0 = arith.constant 0 : i32
    %c0_i32_1 = arith.constant 0 : i32
    return %c0_i32, %c0_i32_0 : i32, i32
  }
  func.func @transform_7(%arg0: i32) -> (i32, i32) {
    %c0_i32 = arith.constant 0 : i32
    %c0_i32_0 = arith.constant 0 : i32
    %c0_i32_1 = arith.constant 0 : i32
    return %c0_i32, %c0_i32_0 : i32, i32
  }
  func.func @transform_8(%arg0: i32) -> (i32, i32) {
    %c0_i32 = arith.constant 0 : i32
    %c0_i32_0 = arith.constant 0 : i32
    return %c0_i32, %arg0 : i32, i32
  }
}

</mosaic_0001>

<bundles_post_ra>
// kernel: tpu_custom_call.1
= control target key start
LH: loop header
LB: loop body
LE: loop exit
PB: predicated region body
PF: predicated region fallthrough
CT: control target
= control target key end

     0   :  { %13 = vsyncpa [#allocation3], 0  ;;  %s1438_s0 = inlined_call_operand.hbm [shape: bf16[16,512], index: 0, kind: input, shape index: {}]   ;;  %s1439_s1 = inlined_call_operand.vmem [shape: f32[9,512], index: 1, kind: input, shape index: {}]   ;;  %s1440_s2 = inlined_call_operand.vmem [shape: bf16[8,16], index: 2, kind: input, shape index: {}]   ;;  %s1441_s3 = inlined_call_operand.vmem [shape: f32[8,1], index: 3, kind: input, shape index: {}]   ;;  %s1442_s4 = inlined_call_operand.vmem [shape: bf16[8,72], index: 4, kind: input, shape index: {}]   ;;  %s1443_s5 = inlined_call_operand.vmem [shape: f32[8,1], index: 5, kind: input, shape index: {}]   ;;  %s1444_s6 = inlined_call_operand.vmem [shape: bf16[32,24], index: 6, kind: input, shape index: {}]   ;;  %s1445_s7 = inlined_call_operand.vmem [shape: f32[32,1], index: 7, kind: input, shape index: {}]   ;;  %s1446_s8 = inlined_call_operand.hbm [shape: f32[32,512], index: 8, kind: output, shape index: {}]  }
   0x1   :  { %14 = vsyncpa [#allocation4], 0  ;;  %s948_s27 = smov [#allocation2]   ;;  %s900_s9 = scalar_lea.hbm %s1438_s0, 512 }
   0x2   :  { %s20_s28 = sshll.u32 %s948_s27, 4  ;;  %p901_p0 = scmp.ne.s32.totalorder %s1438_s0, %s900_s9  ;;  %s21_s28 = int_to_ptr.vmem [resolvable:$true] %s20_s28 }
   0x3   :  { %p904_p1 = scmp.lt.u32.totalorder %s900_s9, %s1438_s0 }
   0x5   :  { %p906_p2 = pnand %p904_p1, %p901_p0 }
   0x7   :  { %909 = shalt.err (!%p906_p2)
}
   0x8   :  { %s910_s14 = scalar_lea.vmem %s21_s28, 512  ;;  %p915_p4 = scmp.lt.s32.totalorder %s21_s28, %s21_s28 }
   0x9   :  { %p911_p3 = scmp.ne.s32.totalorder %s21_s28, %s910_s14  ;;  %p916_p5 = scmp.lt.s32.totalorder %s910_s14, %s910_s14 }
   0xb   :  { %p917_p6 = por %p916_p5, %p915_p4 }
   0xd   :  { %p918_p7 = pnand %p917_p6, %p911_p3 }
   0xf   :  { %921 = shalt.err (!%p918_p7)
}
  0x10   :  { %s949_s15 = smov 256   ;;  %s950_s16 = smov 16  }
  0x11   :  { %26 = dma.hbm_to_vmem [thread:$0]  %s1438_s0, 512, %s21_s28, [#allocation3], %s949_s15, %s949_s15, %s950_s16  }
  0x12   :  { %944 = dma.done.wait [#allocation3], 512  }
  0x13   :  { %945 = vsyncadd [#allocation3], 4294966784  ;;  %v1447_v0 = vmov 0   ;;  %v1024_v1 = vld [vmem:[#allocation2] sm:$0xff]  ;;  %v1026_v2 = vld [vmem:[#allocation2 + $0x10] sm:$0xff]  ;;  %vm76_vm0 = vcmask 130048   ;;  %v174_v33 = vlaneseq }
  0x14   :  { %112 = vmatprep.mubr.bf16.mxu0 %v1447_v0  ;;  %153 = vmatprep.mubr.bf16.mxu1 %v1447_v0  ;;  %v1028_v3 = vld [vmem:[#allocation2 + $0x8] sm:$0xff]  ;;  %v846_v4 = vcombine.high %v1024_v1, %v1026_v2  ;;  %v1032_v5 = vld [vmem:[#allocation2 + $0x18] sm:$0xff]  ;;  %v845_v6 = vcombine.low %v1024_v1, %v1026_v2  ;;  %v50_v7 = vld [vmem:[%s1441_s3] sm:$0xff]  ;;  %s953_s3 = smov 15   ;;  %s954_s22 = smov 1   ;;  %vm518_vm9 = vcmask 1043456  }
  0x15   :  { %888 = vset.pattern.permute.xlu0 %v1447_v0  ;;  %889 = vset.pattern.permute.xlu1 %v1447_v0  ;;  %v848_v8 = vcombine.high %v1028_v3, %v1032_v5  ;;  %v847_v9 = vcombine.low %v1028_v3, %v1032_v5  ;;  %v49_v10 = vld [vmem:[%s1440_s2] sm:$0xf]  ;;  %s952_s2 = smov 17   ;;  %s955_s23 = smov 127   ;;  %v639_v29 = vld [vmem:[%s1445_s7 + $0x10] sm:$0xff]  ;;  %v638_v31 = vld [vmem:[%s1445_s7 + $0x8] sm:$0xff] }
  0x16   :  { %53 = vperm.xlu0 %888, %v50_v7   ;;  %80 = vmatprep.subr.bf16.mxu0 %v846_v4  ;;  %s956_s24 = smov 113   ;;  %s957_s25 = smov 112   ;;  %v637_v28 = vld [vmem:[%s1445_s7] sm:$0xff]  ;;  %v640_v32 = vld [vmem:[%s1445_s7 + $0x18] sm:$0xff]  ;;  %v184_v36 = vshrl.u32 %v174_v33, 7  ;;  %v1115_v37 = vand.u32 127, %v174_v33 }
  0x17   :  { %121 = vmatprep.subr.bf16.mxu1 %v848_v8  ;;  %81 = vmatpush1.bf16.msra.mxu0 %v845_v6  ;;  %s958_s26 = smov 111   ;;  %v508_v30 = vld [vmem:[%s1443_s5] sm:$0xff]  ;;  %vm514_vm10 = vcmask 588800   ;;  %vm671_vm11 = vcmask 195584  }
  0x18   :  { %122 = vmatpush1.bf16.msra.mxu1 %v847_v9  ;;  %v1117_v40 = vsub.s32 3, %v184_v36  ;;  %v1122_v41 = vld [vmem:[%s1439_s1] ss:$8 sm:$0xf]  ;;  %vm176_vm1 = vcmp.lt.s32.totalorder %v1115_v37, 17  ;;  %vm215_vm2 = vcmp.lt.s32.totalorder %v1115_v37, 16 }
  0x19   :  { %v1128_v44 = vld [vmem:[%s1439_s1 + $0x1] ss:$8 sm:$0xf]  ;;  %v1158_v62 = vsub.s32 0, %v184_v36  ;;  %v1160_v63 = vsub.s32 1, %v184_v36  ;;  %v1162_v4 = vsub.s32 2, %v184_v36 }
  0x1a   :  { %849 = vmatmul.mubr.msk.bf16.vlgmr.msra.gmra.mrb[0].mxu0 %vm76_vm0, %v49_v10  ;;  %v198_v45 = vrot.slane %v1122_v41, %v1117_v40  ;;  %v238_v46 = vrot.slane %v1128_v44, %v1117_v40  ;;  %v1167_v6 = vld [vmem:[%s1439_s1 + $0x2] ss:$8 sm:$0xf]  ;;  %vm255_vm3 = vcmp.lt.s32.totalorder %v1115_v37, 15  ;;  %vm295_vm4 = vcmp.lt.s32.totalorder %v1115_v37, 1 }
  0x1b   :  { %850 = vmatmul.mubr.msk.bf16.vlgmr.msra.gmra.mrb[0].mxu1 %vm76_vm0, %v49_v10  ;;  %563 = vmatprep.mubr.bf16.mxu0 %v1447_v0  ;;  %v186_v9 = vrot.slane %v1122_v41, %v1158_v62  ;;  %v230_v10 = vrot.slane %v1128_v44, %v1160_v63  ;;  %vm335_vm5 = vcmp.lt.s32.totalorder %v1115_v37, 127  ;;  %vm375_vm6 = vcmp.lt.s32.totalorder %v1115_v37, 113 }
  0x1c   :  { %604 = vmatprep.mubr.bf16.mxu1 %v1447_v0  ;;  %vm415_vm7 = vcmp.lt.s32.totalorder %v1115_v37, 112  ;;  %vm455_vm8 = vcmp.lt.s32.totalorder %v1115_v37, 111  ;;  %v507_v37 = vld [vmem:[%s1442_s4] sm:$0xf] }
  0x95   :  { %v54_v11 = vpop.permute.xlu0 %53 }
  0xed   :  { %v114_v12 = vpop.f32.mrb[0].mxu0 }
  0xee   :  { %v115_v13 = vadd.f32 %v114_v12, %v54_v11  ;;  %v155_v14 = vpop.f32.mrb[0].mxu1  ;;  %v116_v15 = vpop.f32.mrb[1].mxu0  ;;  %v234_v12 = vrot.slane %v1128_v44, %v1162_v4 }
  0xef   :  { %v156_v16 = vadd.f32 %v155_v14, %v54_v11  ;;  %v157_v17 = vpop.f32.mrb[1].mxu1  ;;  %v118_v18 = vpop.f32.mrb[2].mxu0  ;;  %v117_v25 = vadd.f32 %v116_v15, %v54_v11  ;;  %v270_v14 = vrot.slane %v1167_v6, %v1160_v63  ;;  %v1192_v15 = vld [vmem:[%s1439_s1 + $0x5] ss:$8 sm:$0xf] }
  0xf0   :  { %v1048_v19 = vmax.f32 %v115_v13, 0.0  ;;  %v158_v20 = vadd.f32 %v157_v17, %v54_v11  ;;  %v159_v21 = vpop.f32.mrb[2].mxu1  ;;  %v119_v22 = vpop.f32.mrb[3].mxu0  ;;  %v1180_v11 = vld [vmem:[%s1439_s1 + $0x3] ss:$8 sm:$0xf]  ;;  %v226_v13 = vrot.slane %v1128_v44, %v1158_v62  ;;  %v266_v17 = vrot.slane %v1167_v6, %v1158_v62 }
  0xf1   :  { %v1050_v23 = vmax.f32 %v156_v16, 0.0  ;;  %v160_v24 = vpop.f32.mrb[3].mxu1  ;;  %v1062_v27 = vmax.f32 %v117_v25, 0.0  ;;  %v274_v16 = vrot.slane %v1167_v6, %v1162_v4  ;;  %v278_v18 = vrot.slane %v1167_v6, %v1117_v40  ;;  %v1206_v21 = vld [vmem:[%s1439_s1 + $0x6] ss:$8 sm:$0xf] }
  0xf2   :  { %166 = vrot.lane.b32.xlu0 %v1048_v19, %s952_s2  ;;  %v1056_v26 = vmax.f32 %v158_v20, 0.0  ;;  %v310_v24 = vrot.slane %v1180_v11, %v1160_v63  ;;  %v314_v25 = vrot.slane %v1180_v11, %v1162_v4  ;;  %v358_v44 = vrot.slane %v1192_v15, %v1117_v40 }
  0xf3   :  { %170 = vrot.lane.b32.xlu1 %v1050_v23, %s952_s2  ;;  %v1449_v6 = vrot.slane %v1192_v15, %v1158_v62 }
  0xf6   :  { %172 = vrot.lane.b32.xlu0 %v1056_v26, %s952_s2 }
  0xf7   :  { %207 = vrot.lane.b32.xlu1 %v1048_v19, %s950_s16 }
  0xfa   :  { %209 = vrot.lane.b32.xlu0 %v1062_v27, %s950_s16 }
  0xfb   :  { %211 = vrot.lane.b32.xlu1 %v1050_v23, %s950_s16 }
  0xfe   :  { %213 = vrot.lane.b32.xlu0 %v1056_v26, %s950_s16 }
  0xff   :  { %247 = vrot.lane.b32.xlu1 %v1048_v19, %s953_s3 }
 0x102   :  { %249 = vrot.lane.b32.xlu0 %v1062_v27, %s953_s3 }
 0x103   :  { %251 = vrot.lane.b32.xlu1 %v1050_v23, %s953_s3 }
 0x106   :  { %253 = vrot.lane.b32.xlu0 %v1056_v26, %s953_s3 }
 0x107   :  { %287 = vrot.lane.b32.xlu1 %v1048_v19, %s954_s22 }
 0x10a   :  { %289 = vrot.lane.b32.xlu0 %v1062_v27, %s954_s22 }
 0x10b   :  { %291 = vrot.lane.b32.xlu1 %v1050_v23, %s954_s22 }
 0x10e   :  { %293 = vrot.lane.b32.xlu0 %v1056_v26, %s954_s22 }
 0x10f   :  { %327 = vrot.lane.b32.xlu1 %v1048_v19, %s955_s23 }
 0x112   :  { %329 = vrot.lane.b32.xlu0 %v1062_v27, %s955_s23 }
 0x113   :  { %331 = vrot.lane.b32.xlu1 %v1050_v23, %s955_s23 }
 0x116   :  { %333 = vrot.lane.b32.xlu0 %v1056_v26, %s955_s23 }
 0x117   :  { %367 = vrot.lane.b32.xlu1 %v1048_v19, %s956_s24 }
 0x11a   :  { %369 = vrot.lane.b32.xlu0 %v1062_v27, %s956_s24 }
 0x11b   :  { %371 = vrot.lane.b32.xlu1 %v1050_v23, %s956_s24 }
 0x11e   :  { %373 = vrot.lane.b32.xlu0 %v1056_v26, %s956_s24 }
 0x11f   :  { %168 = vrot.lane.b32.xlu1 %v1062_v27, %s952_s2 }
 0x122   :  { %409 = vrot.lane.b32.xlu0 %v1062_v27, %s957_s25 }
 0x123   :  { %407 = vrot.lane.b32.xlu1 %v1048_v19, %s957_s25 }
 0x126   :  { %413 = vrot.lane.b32.xlu0 %v1056_v26, %s957_s25 }
 0x127   :  { %411 = vrot.lane.b32.xlu1 %v1050_v23, %s957_s25 }
 0x12a   :  { %449 = vrot.lane.b32.xlu0 %v1062_v27, %s958_s26 }
 0x12b   :  { %447 = vrot.lane.b32.xlu1 %v1048_v19, %s958_s26 }
 0x12e   :  { %453 = vrot.lane.b32.xlu0 %v1056_v26, %s958_s26 }
 0x12f   :  { %451 = vrot.lane.b32.xlu1 %v1050_v23, %s958_s26 }
 0x132   :  { %643 = vperm.xlu0 %888, %v637_v28   ;;  %v306_v28 = vrot.slane %v1180_v11, %v1158_v62 }
 0x133   :  { %511 = vperm.xlu1 %889, %v508_v30   ;;  %v318_v30 = vrot.slane %v1180_v11, %v1117_v40  ;;  %v194_v11 = vrot.slane %v1122_v41, %v1162_v4 }
 0x136   :  { %653 = vperm.xlu0 %888, %v639_v29  }
 0x137   :  { %648 = vperm.xlu1 %889, %v638_v31  }
 0x13b   :  { %658 = vperm.xlu1 %889, %v640_v32   ;;  %v350_v32 = vrot.slane %v1192_v15, %v1160_v63 }
 0x164   :  { %v1111_v34 = vpop.permute.xlu0 %166 }
 0x165   :  { %v1113_v35 = vpop.permute.xlu1 %170 }
 0x168   :  { %v173_v38 = vpop.permute.xlu0 %172 }
 0x169   :  { %v208_v39 = vpop.permute.xlu1 %207  ;;  %v177_v47 = vsel %vm176_vm1, %v1113_v35, %v173_v38  ;;  %v180_v33 = vsel %vm176_vm1, %v173_v38, %v1111_v34 }
 0x16a   :  { %v206_v51 = vmul.f32 %v198_v45, %v177_v47 }
 0x16c   :  { %v210_v42 = vpop.permute.xlu0 %209 }
 0x16d   :  { %v212_v43 = vpop.permute.xlu1 %211  ;;  %v218_v47 = vsel %vm215_vm2, %v208_v39, %v210_v42 }
 0x170   :  { %v214_v48 = vpop.permute.xlu0 %213 }
 0x171   :  { %v1138_v49 = vpop.permute.xlu1 %247  ;;  %v216_v50 = vsel %vm215_vm2, %v212_v43, %v214_v48  ;;  %v219_v22 = vsel %vm215_vm2, %v214_v48, %v208_v39 }
 0x172   :  { %v246_v52 = vmul.f32 %v238_v46, %v216_v50  ;;  %v1237_v46 = vld [vmem:[%s1439_s1 + $0x7] ss:$8 sm:$0xf]  ;;  %v243_v48 = vmul.f32 %v226_v13, %v219_v22  ;;  %v398_v13 = vrot.slane %v1206_v21, %v1117_v40  ;;  %v203_v22 = vmul.f32 %v186_v9, %v180_v33 }
 0x173   :  { %v438_v33 = vrot.slane %v1237_v46, %v1117_v40 }
 0x174   :  { %v1142_v53 = vpop.permute.xlu0 %249  ;;  %v490_v54 = vpack.c.bf16 %v246_v52, %v206_v51  ;;  %v190_v51 = vrot.slane %v1122_v41, %v1160_v63  ;;  %v217_v52 = vsel %vm215_vm2, %v210_v42, %v212_v43  ;;  %v244_v43 = vmul.f32 %v230_v10, %v218_v47 }
 0x175   :  { %v1144_v55 = vpop.permute.xlu1 %251  ;;  %v258_v0 = vsel %vm255_vm3, %v1138_v49, %v1142_v53  ;;  %v245_v39 = vmul.f32 %v234_v12, %v217_v52  ;;  %v487_v38 = vpack.c.bf16 %v243_v48, %v203_v22 }
 0x176   :  { %572 = vmatprep.subr.bf16.mxu1 %v490_v54  ;;  %v257_v42 = vsel %vm255_vm3, %v1142_v53, %v1144_v55  ;;  %v284_v41 = vmul.f32 %v270_v14, %v258_v0 }
 0x178   :  { %v1146_v56 = vpop.permute.xlu0 %253 }
 0x179   :  { %v1148_v57 = vpop.permute.xlu1 %287  ;;  %v256_v9 = vsel %vm255_vm3, %v1144_v55, %v1146_v56 }
 0x17c   :  { %v1150_v58 = vpop.permute.xlu0 %289 }
 0x17d   :  { %v1152_v59 = vpop.permute.xlu1 %291  ;;  %v298_v10 = vsel %vm295_vm4, %v1148_v57, %v1150_v58 }
 0x17e   :  { %v297_v12 = vsel %vm295_vm4, %v1150_v58, %v1152_v59 }
 0x180   :  { %v1154_v60 = vpop.permute.xlu0 %293 }
 0x181   :  { %v1156_v61 = vpop.permute.xlu1 %327  ;;  %v296_v45 = vsel %vm295_vm4, %v1152_v59, %v1154_v60  ;;  %v299_v53 = vsel %vm295_vm4, %v1154_v60, %v1148_v57  ;;  %v259_v57 = vsel %vm255_vm3, %v1146_v56, %v1138_v49  ;;  %v324_v59 = vmul.f32 %v310_v24, %v298_v10 }
 0x182   :  { %v326_v52 = vmul.f32 %v318_v30, %v296_v45  ;;  %v286_v30 = vmul.f32 %v278_v18, %v256_v9  ;;  %v325_v45 = vmul.f32 %v314_v25, %v297_v12  ;;  %v323_v22 = vmul.f32 %v306_v28, %v299_v53 }
 0x183   :  { %v285_v18 = vmul.f32 %v274_v16, %v257_v42  ;;  %v283_v24 = vmul.f32 %v266_v17, %v259_v57  ;;  %v1451_v12 = vrot.slane %v1237_v46, %v1160_v63 }
 0x184   :  { %v1169_v7 = vpop.permute.xlu0 %329  ;;  %v494_v28 = vpack.c.bf16 %v326_v52, %v286_v30 }
 0x185   :  { %v1171_v8 = vpop.permute.xlu1 %331  ;;  %v493_v16 = vpack.c.bf16 %v325_v45, %v285_v18 }
 0x188   :  { %v1201_v20 = vpop.permute.xlu0 %333 }
 0x189   :  { %v1216_v29 = vpop.permute.xlu1 %367  ;;  %v339_v0 = vsel %vm335_vm5, %v1201_v20, %v1156_v61  ;;  %v336_v25 = vsel %vm335_vm5, %v1171_v8, %v1201_v20  ;;  %v857_v20 = vld [vmem:[%s1439_s1 + $0x20] ss:$8 sm:$0xf] }
 0x18c   :  { %v1243_v50 = vpop.permute.xlu0 %369 }
 0x18d   :  { %v1249_v54 = vpop.permute.xlu1 %371 }
 0x190   :  { %v374_v47 = vpop.permute.xlu0 %373 }
 0x191   :  { %v169_v48 = vpop.permute.xlu1 %168 }
 0x192   :  { %v178_v55 = vsel %vm176_vm1, %v169_v48, %v1113_v35  ;;  %v179_v58 = vsel %vm176_vm1, %v1111_v34, %v169_v48  ;;  %v337_v35 = vsel %vm335_vm5, %v1169_v7, %v1171_v8  ;;  %v338_v34 = vsel %vm335_vm5, %v1156_v61, %v1169_v7 }
 0x193   :  { %v204_v60 = vmul.f32 %v190_v51, %v179_v58  ;;  %v205_v14 = vmul.f32 %v194_v11, %v178_v55  ;;  %v366_v48 = vmul.f32 %v358_v44, %v339_v0  ;;  %v364_v51 = vmul.f32 %v350_v32, %v337_v35 }
 0x194   :  { %v410_v36 = vpop.permute.xlu0 %409  ;;  %v379_v61 = vsel %vm375_vm6, %v374_v47, %v1216_v29  ;;  %v492_v7 = vpack.c.bf16 %v324_v59, %v284_v41  ;;  %v491_v44 = vpack.c.bf16 %v323_v22, %v283_v24  ;;  %v363_v17 = vmul.f32 %v1449_v6, %v338_v34 }
 0x195   :  { %v489_v31 = vpack.c.bf16 %v245_v39, %v205_v14  ;;  %v408_v49 = vpop.permute.xlu1 %407  ;;  %v488_v56 = vpack.c.bf16 %v244_v43, %v204_v60  ;;  %v1450_v32 = vrot.slane %v1192_v15, %v1162_v4  ;;  %v377_v11 = vsel %vm375_vm6, %v1243_v50, %v1249_v54 }
 0x196   :  { %v498_v42 = vpack.c.bf16 %v366_v48, %v1056_v26  ;;  %v406_v41 = vmul.f32 %v398_v13, %v379_v61  ;;  %v418_v10 = vsel %vm415_vm7, %v408_v49, %v410_v36  ;;  %v496_v52 = vpack.c.bf16 %v364_v51, %v1062_v27 }
 0x197   :  { %531 = vmatprep.subr.bf16.mxu0 %v488_v56  ;;  %573 = vmatpush1.bf16.msra.mxu1 %v489_v31  ;;  %v365_v31 = vmul.f32 %v1450_v32, %v336_v25  ;;  %v466_v26 = vrot.slane %v857_v20, %v1158_v62  ;;  %v376_v13 = vsel %vm375_vm6, %v1249_v54, %v374_v47 }
 0x198   :  { %532 = vmatpush1.bf16.msra.mxu0 %v487_v38  ;;  %574 = vmatprep.subr.bf16.mxu1 %v494_v28  ;;  %v414_v8 = vpop.permute.xlu0 %413  ;;  %v470_v55 = vrot.slane %v857_v20, %v1160_v63  ;;  %v378_v58 = vsel %vm375_vm6, %v1216_v29, %v1243_v50  ;;  %v1452_v27 = vrot.slane %v1206_v21, %v1160_v63 }
 0x199   :  { %v412_v39 = vpop.permute.xlu1 %411  ;;  %533 = vmatprep.subr.bf16.mxu0 %v492_v7  ;;  %v419_v38 = vsel %vm415_vm7, %v414_v8, %v408_v49  ;;  %v1453_v54 = vrot.slane %v1237_v46, %v1162_v4  ;;  %v495_v60 = vpack.c.bf16 %v363_v17, %v1048_v19  ;;  %v478_v29 = vrot.slane %v857_v20, %v1117_v40 }
 0x19a   :  { %v417_v43 = vsel %vm415_vm7, %v410_v36, %v412_v39  ;;  %v416_v15 = vsel %vm415_vm7, %v412_v39, %v414_v8  ;;  %v446_v9 = vmul.f32 %v438_v33, %v419_v38  ;;  %v497_v36 = vpack.c.bf16 %v365_v31, %v1050_v23 }
 0x19b   :  { %v444_v53 = vmul.f32 %v1451_v12, %v417_v43  ;;  %575 = vmatpush1.bf16.msra.mxu1 %v493_v16  ;;  %v404_v57 = vmul.f32 %v1452_v27, %v377_v11  ;;  %v445_v47 = vmul.f32 %v1453_v54, %v416_v15  ;;  %v1454_v23 = vrot.slane %v1237_v46, %v1158_v62 }
 0x19c   :  { %534 = vmatpush1.bf16.msra.mxu0 %v491_v44  ;;  %576 = vmatprep.subr.bf16.mxu1 %v498_v42  ;;  %v450_v0 = vpop.permute.xlu0 %449  ;;  %v502_v33 = vpack.c.bf16 %v446_v9, %v406_v41  ;;  %v1455_v63 = vrot.slane %v1206_v21, %v1162_v4  ;;  %v474_v35 = vrot.slane %v857_v20, %v1162_v4  ;;  %v1457_v44 = vmov 0  }
 0x19d   :  { %v448_v59 = vpop.permute.xlu1 %447  ;;  %535 = vmatprep.subr.bf16.mxu0 %v496_v52  ;;  %v443_v14 = vmul.f32 %v1454_v23, %v418_v10  ;;  %v500_v22 = vpack.c.bf16 %v444_v53, %v404_v57  ;;  %v1456_v19 = vrot.slane %v1206_v21, %v1158_v62  ;;  %v618_v38 = vunpack.c.h.bf16 %v1024_v1 }
 0x19e   :  { %v458_v30 = vsel %vm455_vm8, %v448_v59, %v450_v0  ;;  %v405_v50 = vmul.f32 %v1455_v63, %v376_v13  ;;  %v620_v41 = vunpack.c.h.bf16 %v1028_v3  ;;  %v617_v10 = vunpack.c.l.bf16 %v1024_v1 }
 0x19f   :  { %v483_v45 = vmul.f32 %v466_v26, %v458_v30  ;;  %577 = vmatpush1.bf16.msra.mxu1 %v497_v36  ;;  %v403_v34 = vmul.f32 %v1456_v19, %v378_v58  ;;  %v619_v53 = vunpack.c.l.bf16 %v1028_v3  ;;  %v862_v27 = vcombine.low %v1026_v2, %v1026_v2 }
 0x1a0   :  { %536 = vmatpush1.bf16.msra.mxu0 %v495_v60  ;;  %578 = vmatprep.subr.bf16.mxu1 %v502_v33  ;;  %v454_v46 = vpop.permute.xlu0 %453  ;;  %v501_v48 = vpack.c.bf16 %v445_v47, %v405_v50  ;;  %v863_v33 = vcombine.high %v1026_v2, %v1026_v2  ;;  %v864_v1 = vcombine.low %v1032_v5, %v1032_v5  ;;  %v898_v2 = vld [vmem:[%s1444_s6] sm:$0xff]  }
 0x1a1   :  { %v452_v49 = vpop.permute.xlu1 %451  ;;  %537 = vmatprep.subr.bf16.mxu0 %v500_v22  ;;  %v459_v40 = vsel %vm455_vm8, %v454_v46, %v448_v59  ;;  %v499_v56 = vpack.c.bf16 %v443_v14, %v403_v34  ;;  %v503_v25 = vpack.c.bf16 %v483_v45, %v483_v45  ;;  %v679_v54 = vsel %vm518_vm9, %v862_v27, 0 }
 0x1a2   :  { %v457_v18 = vsel %vm455_vm8, %v450_v0, %v452_v49  ;;  %v456_v4 = vsel %vm455_vm8, %v452_v49, %v454_v46  ;;  %v486_v24 = vmul.f32 %v478_v29, %v459_v40  ;;  %v685_v47 = vsel %vm518_vm9, %v864_v1, 0 }
 0x1a3   :  { %v484_v62 = vmul.f32 %v470_v55, %v457_v18  ;;  %v485_v21 = vmul.f32 %v474_v35, %v456_v4  ;;  %579 = vmatpush1.bf16.msra.mxu1 %v501_v48  ;;  %v520_v7 = vsel %vm518_vm9, %v503_v25, 0  ;;  %v865_v55 = vcombine.high %v1032_v5, %v1032_v5  ;;  %v899_v5 = vld [vmem:[%s1444_s6 + $0x8] sm:$0xff]   ;;  %s959_s6 = smov [#allocation5]  }
 0x1a4   :  { %v506_v28 = vpack.c.bf16 %v486_v24, %v486_v24  ;;  %538 = vmatpush1.bf16.msra.mxu0 %v499_v56  ;;  %s833_s30 = sshll.u32 %s959_s6, 4  ;;  %s834_s30 = int_to_ptr.vmem [resolvable:$true] %s833_s30 }
 0x1a5   :  { %v504_v51 = vpack.c.bf16 %v484_v62, %v484_v62  ;;  %v505_v61 = vpack.c.bf16 %v485_v21, %v485_v21  ;;  %s922_s9 = scalar_lea.vmem %s834_s30, 2048  ;;  %p927_p9 = scmp.lt.s32.totalorder %s834_s30, %s834_s30 }
 0x1a6   :  { %860 = vmatprep.subr.msk.bf16.mxu1 %vm518_vm9, %v506_v28  ;;  %p923_p8 = scmp.ne.s32.totalorder %s834_s30, %s922_s9  ;;  %p928_p10 = scmp.lt.s32.totalorder %s922_s9, %s922_s9 }
 0x1a7   :  { %858 = vmatprep.subr.msk.bf16.mxu0 %vm518_vm9, %v504_v51  ;;  %v526_v16 = vsel %vm518_vm9, %v505_v61, 0 }
 0x1a8   :  { %540 = vmatpush1.bf16.msra.mxu0 %v520_v7  ;;  %581 = vmatpush1.bf16.msra.mxu1 %v526_v16  ;;  %p929_p11 = por %p928_p10, %p927_p9 }
 0x1aa   :  { %p930_p12 = pnand %p929_p11, %p923_p8 }
 0x1ab   :  { %859 = vmatmul.mubr.msk.bf16.vlgmr.msra.gmra.mrb[4].mxu0 %vm514_vm10, %v507_v37  ;;  %861 = vmatmul.mubr.msk.bf16.vlgmr.msra.gmra.mrb[4].mxu1 %vm514_vm10, %v507_v37 }
 0x1ac   :  { %722 = vmatprep.mubr.bf16.mxu0 %v1457_v44  ;;  %775 = vmatprep.mubr.bf16.mxu1 %v1457_v44 }
 0x1b1   :  { %v644_v59 = vpop.permute.xlu0 %643 }
 0x1b2   :  { %v512_v6 = vpop.permute.xlu1 %511 }
 0x1b5   :  { %v654_v61 = vpop.permute.xlu0 %653 }
 0x1b6   :  { %v649_v60 = vpop.permute.xlu1 %648 }
 0x1ba   :  { %v659_v7 = vpop.permute.xlu1 %658 }
 0x27e   :  { %v565_v17 = vpop.f32.mrb[4].mxu0  ;;  %v606_v8 = vpop.f32.mrb[4].mxu1 }
 0x27f   :  { %v566_v20 = vadd.f32 %v565_v17, %v512_v6  ;;  %v607_v32 = vadd.f32 %v606_v8, %v512_v6  ;;  %v567_v31 = vpop.f32.mrb[5].mxu0  ;;  %v608_v11 = vpop.f32.mrb[5].mxu1 }
 0x280   :  { %v568_v39 = vadd.f32 %v567_v31, %v512_v6  ;;  %v609_v42 = vadd.f32 %v608_v11, %v512_v6  ;;  %v569_v43 = vpop.f32.mrb[6].mxu0  ;;  %v610_v15 = vpop.f32.mrb[6].mxu1 }
 0x281   :  { %v613_v9 = vmax.f32 %v566_v20, 0.0  ;;  %v615_v12 = vmax.f32 %v607_v32, 0.0  ;;  %v570_v52 = vpop.f32.mrb[7].mxu0  ;;  %v611_v26 = vpop.f32.mrb[7].mxu1 }
 0x282   :  { %v614_v13 = vmax.f32 %v568_v39, 0.0  ;;  %v616_v0 = vmax.f32 %v609_v42, 0.0 }
 0x283   :  { %v625_v57 = vpack.c.bf16 %v617_v10, %v613_v9  ;;  %v627_v3 = vpack.c.bf16 %v619_v53, %v615_v12 }
 0x284   :  { %v626_v36 = vpack.c.bf16 %v618_v38, %v614_v13  ;;  %v628_v58 = vpack.c.bf16 %v620_v41, %v616_v0 }
 0x286   :  { %690 = vmatprep.subr.bf16.mxu0 %v626_v36  ;;  %743 = vmatprep.subr.bf16.mxu1 %v628_v58 }
 0x287   :  { %691 = vmatpush1.bf16.msra.mxu0 %v625_v57  ;;  %744 = vmatpush1.bf16.msra.mxu1 %v627_v3 }
 0x288   :  { %868 = vmatprep.subr.msk.bf16.mxu0 %vm518_vm9, %v863_v33  ;;  %871 = vmatprep.subr.msk.bf16.mxu1 %vm518_vm9, %v865_v55 }
 0x28b   :  { %693 = vmatpush1.bf16.msra.mxu0 %v679_v54  ;;  %746 = vmatpush1.bf16.msra.mxu1 %v685_v47 }
 0x28e   :  { %869 = vmatmul.mubr.msk.bf16.vlgmr.msra.gmra.mrb[8].mxu0 %vm671_vm11, %v898_v2  ;;  %872 = vmatmul.mubr.msk.bf16.vlgmr.msra.gmra.mrb[8].mxu1 %vm671_vm11, %v898_v2 }
 0x28f   :  { %732 = vmatprep.mubr.bf16.mxu0 %v1457_v44  ;;  %785 = vmatprep.mubr.bf16.mxu1 %v1457_v44 }
 0x296   :  { %870 = vmatmul.mubr.msk.bf16.gmra.mrb[12].mxu0 %vm671_vm11, %v899_v5  ;;  %873 = vmatmul.mubr.msk.bf16.gmra.mrb[12].mxu1 %vm671_vm11, %v899_v5 }
 0x361   :  { %v724_v23 = vpop.f32.mrb[8].mxu0  ;;  %v777_v14 = vpop.f32.mrb[8].mxu1 }
 0x362   :  { %v725_v30 = vadd.f32 %v724_v23, %v644_v59  ;;  %v778_v29 = vadd.f32 %v777_v14, %v644_v59  ;;  %v726_v63 = vpop.f32.mrb[9].mxu0  ;;  %v779_v50 = vpop.f32.mrb[9].mxu1 }
 0x363   :  { %v727_v45 = vadd.f32 %v726_v63, %v644_v59  ;;  %v780_v22 = vadd.f32 %v779_v50, %v644_v59  ;;  %v728_v35 = vpop.f32.mrb[10].mxu0  ;;  %v781_v19 = vpop.f32.mrb[10].mxu1 }
 0x364   :  { %v796_v34 = vmax.f32 %v725_v30, 0.0  ;;  %v798_v46 = vmax.f32 %v778_v29, 0.0  ;;  %v729_v48 = vadd.f32 %v728_v35, %v649_v60  ;;  %v782_v49 = vadd.f32 %v781_v19, %v649_v60  ;;  %v730_v40 = vpop.f32.mrb[11].mxu0  ;;  %v783_v56 = vpop.f32.mrb[11].mxu1 }
 0x365   :  { %v797_v18 = vmax.f32 %v727_v45, 0.0  ;;  %v799_v4 = vmax.f32 %v780_v22, 0.0  ;;  %v731_v24 = vadd.f32 %v730_v40, %v649_v60  ;;  %v784_v25 = vadd.f32 %v783_v56, %v649_v60 }
 0x366   :  { %812 = vst [vmem:[#allocation5] sm:$0xff] %v796_v34  ;;  %814 = vst [vmem:[#allocation5 + $0x10] sm:$0xff] %v798_v46  ;;  %v800_v62 = vmax.f32 %v729_v48, 0.0  ;;  %v802_v21 = vmax.f32 %v782_v49, 0.0 }
 0x367   :  { %813 = vst [vmem:[#allocation5 + $0x8] sm:$0xff] %v797_v18  ;;  %815 = vst [vmem:[#allocation5 + $0x18] sm:$0xff] %v799_v4  ;;  %v801_v28 = vmax.f32 %v731_v24, 0.0  ;;  %v803_v51 = vmax.f32 %v784_v25, 0.0 }
 0x368   :  { %816 = vst [vmem:[#allocation5 + $0x20] sm:$0xff] %v800_v62  ;;  %818 = vst [vmem:[#allocation5 + $0x30] sm:$0xff] %v802_v21 }
 0x369   :  { %817 = vst [vmem:[#allocation5 + $0x28] sm:$0xff] %v801_v28  ;;  %819 = vst [vmem:[#allocation5 + $0x38] sm:$0xff] %v803_v51  ;;  %v734_v16 = vpop.f32.mrb[12].mxu0  ;;  %v787_v37 = vpop.f32.mrb[12].mxu1 }
 0x36a   :  { %v735_v44 = vadd.f32 %v734_v16, %v654_v61  ;;  %v788_v6 = vadd.f32 %v787_v37, %v654_v61  ;;  %v736_v17 = vpop.f32.mrb[13].mxu0  ;;  %v789_v8 = vpop.f32.mrb[13].mxu1 }
 0x36b   :  { %v737_v20 = vadd.f32 %v736_v17, %v654_v61  ;;  %v790_v32 = vadd.f32 %v789_v8, %v654_v61  ;;  %v738_v31 = vpop.f32.mrb[14].mxu0  ;;  %v791_v11 = vpop.f32.mrb[14].mxu1 }
 0x36c   :  { %v804_v39 = vmax.f32 %v735_v44, 0.0  ;;  %v806_v38 = vmax.f32 %v788_v6, 0.0  ;;  %v739_v42 = vadd.f32 %v738_v31, %v659_v7  ;;  %v792_v41 = vadd.f32 %v791_v11, %v659_v7  ;;  %v740_v43 = vpop.f32.mrb[15].mxu0  ;;  %v793_v15 = vpop.f32.mrb[15].mxu1 }
 0x36d   :  { %v805_v9 = vmax.f32 %v737_v20, 0.0  ;;  %v807_v10 = vmax.f32 %v790_v32, 0.0  ;;  %v741_v12 = vadd.f32 %v740_v43, %v659_v7  ;;  %v794_v53 = vadd.f32 %v793_v15, %v659_v7 }
 0x36e   :  { %820 = vst [vmem:[#allocation5 + $0x40] sm:$0xff] %v804_v39  ;;  %822 = vst [vmem:[#allocation5 + $0x50] sm:$0xff] %v806_v38  ;;  %v808_v52 = vmax.f32 %v739_v42, 0.0  ;;  %v810_v26 = vmax.f32 %v792_v41, 0.0 }
 0x36f   :  { %821 = vst [vmem:[#allocation5 + $0x48] sm:$0xff] %v805_v9  ;;  %823 = vst [vmem:[#allocation5 + $0x58] sm:$0xff] %v807_v10  ;;  %v809_v13 = vmax.f32 %v741_v12, 0.0  ;;  %v811_v0 = vmax.f32 %v794_v53, 0.0 }
 0x370   :  { %824 = vst [vmem:[#allocation5 + $0x60] sm:$0xff] %v808_v52  ;;  %826 = vst [vmem:[#allocation5 + $0x70] sm:$0xff] %v810_v26 }
 0x371   :  { %825 = vst [vmem:[#allocation5 + $0x68] sm:$0xff] %v809_v13  ;;  %827 = vst [vmem:[#allocation5 + $0x78] sm:$0xff] %v811_v0 }
 0x372   :  { %933 = shalt.err (!%p930_p12)
}
 0x373   :  { %s934_s12 = scalar_lea.hbm %s1446_s8, 2048 }
 0x374   :  { %p935_p13 = scmp.ne.s32.totalorder %s1446_s8, %s934_s12  ;;  %p938_p0 = scmp.lt.u32.totalorder %s934_s12, %s1446_s8 }
 0x376   :  { %p940_p1 = pnand %p938_p0, %p935_p13 }
 0x378   :  { %943 = shalt.err (!%p940_p1)
}
 0x379   :  { %s960_s7 = smov 512   ;;  %s961_s16 = smov 32  }
 0x37a   :  { %839 = dma.vmem_to_hbm [thread:$0]  %s834_s30, 2048, %s1446_s8, [#allocation4], %s960_s7, %s960_s7, %s961_s16  }
 0x37b   :  { %946 = dma.done.wait [#allocation4], 2048  }
 0x37c   :  { %947 = vsyncadd [#allocation4], 4294965248 }
 0x37d   :  { %843 = vsyncpa [#allocation3], 1 }
 0x37e   :  { %844 = vsyncpa [#allocation4], 1 }

</bundles_post_ra>
